<compile_context>
chip_gen: v5e
topology: v5e:2x2
jax: 0.10.0
libtpu: 0.0.40
codegen_flags: <defaults>
</compile_context>

<pallas_src>
import functools

import jax
import jax.numpy as jnp
from jax.experimental import pallas as pl
from jax.experimental.pallas import tpu as pltpu


# ------------------------------- kernels ---------------------------------- #

def _proj_kernel(x_ref, w_ref, o_ref):
    # o_tile = x_tile @ w
    o_ref[...] = jnp.dot(
        x_ref[...], w_ref[...], preferred_element_type=jnp.float32
    ).astype(o_ref.dtype)


def _proj_bias_kernel(x_ref, w_ref, b_ref, o_ref):
    # o_tile = x_tile @ w + b
    acc = jnp.dot(x_ref[...], w_ref[...], preferred_element_type=jnp.float32)
    o_ref[...] = (acc + b_ref[...]).astype(o_ref.dtype)


def _agg_plain_kernel(adj_ref, h_ref, b_ref, o_ref):
    # o_tile = adj_tile @ H + b
    acc = jnp.dot(adj_ref[...], h_ref[...], preferred_element_type=jnp.float32)
    o_ref[...] = (acc + b_ref[...]).astype(o_ref.dtype)


def _agg_res_kernel(adj_ref, h_ref, b_ref, res_ref, o_ref):
    # o_tile = relu(adj_tile @ H + b) + res_tile
    acc = jnp.dot(adj_ref[...], h_ref[...], preferred_element_type=jnp.float32)
    out = jnp.maximum(acc + b_ref[...], 0.0) + res_ref[...].astype(jnp.float32)
    o_ref[...] = out.astype(o_ref.dtype)


# ------------------------------- wrappers ---------------------------------- #

_TM = 256  # default row tile (fits double-buffered bf16 tiles well under the
           # 32 MiB scoped VMEM on v6e/v7x for large N); clamped to N below.


def _row_tile(n):
    return n if n <= _TM else _TM


def _compiler_params():
    return pltpu.CompilerParams(
        dimension_semantics=("parallel",),   # shard row tiles across TCs (v7x)
        vmem_limit_bytes=64 << 20,
    )


def _itemsize(dt):
    return 2 if jnp.dtype(dt) == jnp.dtype(jnp.bfloat16) else 4


def _project(x, w, bias=None, out_dtype=jnp.bfloat16):
    """Row-tiled o = x @ w (+ bias)."""
    n, d_in = x.shape
    d_out = w.shape[1]
    tm = _row_tile(n)
    grid = (pl.cdiv(n, tm),)

    in_specs = [
        pl.BlockSpec((tm, d_in), lambda i: (i, 0)),      # streamed row tiles
        pl.BlockSpec((d_in, d_out), lambda i: (0, 0)),   # weight resident
    ]
    args = [x, w]
    kernel = _proj_kernel
    if bias is not None:
        in_specs.append(pl.BlockSpec((1, d_out), lambda i: (0, 0)))
        args.append(bias)
        kernel = _proj_bias_kernel

    bytes_accessed = (x.size * _itemsize(x.dtype) + w.size * _itemsize(w.dtype)
                      + n * d_out * _itemsize(out_dtype))
    return pl.pallas_call(
        kernel,
        out_shape=jax.ShapeDtypeStruct((n, d_out), out_dtype),
        grid=grid,
        in_specs=in_specs,
        out_specs=pl.BlockSpec((tm, d_out), lambda i: (i, 0)),
        compiler_params=_compiler_params(),
        cost_estimate=pl.CostEstimate(
            flops=2 * n * d_in * d_out, transcendentals=0,
            bytes_accessed=bytes_accessed),
    )(*args)


def _aggregate(adj, h, bias, res=None):
    """Row-tiled o = adj @ H + b, optionally relu + residual."""
    n = adj.shape[0]
    d_out = h.shape[1]
    tm = _row_tile(n)
    grid = (pl.cdiv(n, tm),)

    in_specs = [
        pl.BlockSpec((tm, n), lambda i: (i, 0)),       # streamed adj row tiles
        pl.BlockSpec((n, d_out), lambda i: (0, 0)),    # H resident across steps
        pl.BlockSpec((1, d_out), lambda i: (0, 0)),    # bias resident
    ]
    args = [adj, h, bias]
    kernel = _agg_plain_kernel
    if res is not None:
        in_specs.append(pl.BlockSpec((tm, d_out), lambda i: (i, 0)))
        args.append(res)
        kernel = _agg_res_kernel

    bytes_accessed = (adj.size * _itemsize(adj.dtype)
                      + h.size * _itemsize(h.dtype) + n * d_out * 4)
    return pl.pallas_call(
        kernel,
        out_shape=jax.ShapeDtypeStruct((n, d_out), jnp.float32),
        grid=grid,
        in_specs=in_specs,
        out_specs=pl.BlockSpec((tm, d_out), lambda i: (i, 0)),
        compiler_params=_compiler_params(),
        cost_estimate=pl.CostEstimate(
            flops=2 * n * n * d_out, transcendentals=0,
            bytes_accessed=bytes_accessed),
    )(*args)


class GCNLayerPallas:
    """JAX/Pallas port of the PyTorch GCNLayer."""

    def __init__(self, adj, input_dims, output_dims, res_connection=False,
                 key=jax.random.PRNGKey(0)):
        self.in_dims = input_dims
        self.out_dims = output_dims
        self.res_con = res_connection

        self.adj = jnp.asarray(adj, jnp.float32)
        self.adj_bf16 = self.adj.astype(jnp.bfloat16)

        k1, k2 = jax.random.split(key)

        def xavier_uniform(k, fan_out, fan_in):
            limit = (6.0 / (fan_in + fan_out)) ** 0.5
            return jax.random.uniform(k, (fan_out, fan_in), jnp.float32,
                                      -limit, limit)

        # nn.Linear stores weight as (out, in); keep the transposed (in, out)
        # layout so kernels do plain row-major matmuls.
        self.w_lin_t = xavier_uniform(k1, output_dims, input_dims).T
        self.b_lin = jnp.zeros((1, output_dims), jnp.float32)
        self.w_res_t = xavier_uniform(k2, output_dims, input_dims).T
        self.b_res = jnp.zeros((1, output_dims), jnp.float32)
        # TODO(synk): PyTorch nn.Linear default-inits bias ~ U(-1/sqrt(fan_in),
        # 1/sqrt(fan_in)); zero bias kept here for deterministic synthetic init.

        self.w_lin_bf16 = self.w_lin_t.astype(jnp.bfloat16)
        self.w_res_bf16 = self.w_res_t.astype(jnp.bfloat16)

    @functools.partial(jax.jit, static_argnums=(0,))
    def _call_plain(self, x):
        h = _project(x.astype(jnp.bfloat16), self.w_lin_bf16)
        return _aggregate(self.adj_bf16, h, self.b_lin)

    @functools.partial(jax.jit, static_argnums=(0,))
    def _call_res_proj(self, x, last_hidden):
        h = _project(x.astype(jnp.bfloat16), self.w_lin_bf16)
        res = _project(last_hidden.astype(jnp.bfloat16), self.w_res_bf16,
                       bias=self.b_res, out_dtype=jnp.float32)
        return _aggregate(self.adj_bf16, h, self.b_lin, res=res)

    @functools.partial(jax.jit, static_argnums=(0,))
    def _call_res_id(self, x, last_hidden):
        h = _project(x.astype(jnp.bfloat16), self.w_lin_bf16)
        return _aggregate(self.adj_bf16, h, self.b_lin,
                          res=last_hidden.astype(jnp.float32))

    def __call__(self, input_feature, last_hidden=None):
        x = jnp.asarray(input_feature, jnp.float32)
        if self.res_con and last_hidden is not None:
            lh = jnp.asarray(last_hidden, jnp.float32)
            if lh.shape[1] != self.out_dims:
                return self._call_res_proj(x, lh)
            return self._call_res_id(x, lh)
        return self._call_plain(x)


# ---------------------------- reference / main ----------------------------- #

def _reference(layer, x, last_hidden=None):
    # Mirrors the kernel numerics: bf16-rounded inputs, f32 accumulation,
    # H stored in bf16 before the aggregation matmul.
    adj = layer.adj_bf16.astype(jnp.float32)
    wl = layer.w_lin_bf16.astype(jnp.float32)
    wr = layer.w_res_bf16.astype(jnp.float32)
    x32 = x.astype(jnp.bfloat16).astype(jnp.float32)
    h = (x32 @ wl).astype(jnp.bfloat16).astype(jnp.float32)
    out = adj @ h + layer.b_lin
    if layer.res_con and last_hidden is not None:
        if last_hidden.shape[1] != out.shape[1]:
            lh32 = last_hidden.astype(jnp.bfloat16).astype(jnp.float32)
            out = jnp.maximum(out, 0.0) + (lh32 @ wr + layer.b_res)
        else:
            out = jnp.maximum(out, 0.0) + last_hidden
    return out


if __name__ == "__main__":
    key = jax.random.PRNGKey(0)
    k_adj, k_x, k_lh, k_lh2, k_params = jax.random.split(key, 5)

    n_nodes, in_dims, out_dims = 64, 32, 128

    # symmetric row-normalized-ish dense adjacency (synthetic)
    a = jax.random.uniform(k_adj, (n_nodes, n_nodes), jnp.float32)
    adj = (a + a.T) / (2.0 * n_nodes)

    x = jax.random.normal(k_x, (n_nodes, in_dims), jnp.float32)
    last_hidden = jax.random.normal(k_lh, (n_nodes, in_dims), jnp.float32)
    last_hidden_same = jax.random.normal(k_lh2, (n_nodes, out_dims), jnp.float32)

    layer = GCNLayerPallas(adj, in_dims, out_dims, res_connection=True,
                           key=k_params)

    # Path 1: residual with projection (last_hidden dim != out dim)
    out1 = layer(x, last_hidden)
    jax.block_until_ready(out1)
    ref1 = _reference(layer, x, last_hidden)
    assert jnp.allclose(out1, ref1, atol=1e-2, rtol=1e-2), "res_proj mismatch"

    # Path 2: identity residual (last_hidden dim == out dim)
    out2 = layer(x, last_hidden_same)
    jax.block_until_ready(out2)
    ref2 = _reference(layer, x, last_hidden_same)
    assert jnp.allclose(out2, ref2, atol=1e-2, rtol=1e-2), "res_id mismatch"

    # Path 3: no residual
    layer_plain = GCNLayerPallas(adj, in_dims, out_dims, res_connection=False,
                                 key=k_params)
    out3 = layer_plain(x)
    jax.block_until_ready(out3)
    ref3 = _reference(layer_plain, x)
    assert jnp.allclose(out3, ref3, atol=1e-2, rtol=1e-2), "plain mismatch"

    print("KERNEL_OK")
</pallas_src>

<mosaic_0001>
module attributes {stable_mosaic.version = 11 : i64} {
  func.func @_proj_kernel(%arg0: i32, %arg1: memref<64x32xbf16, #tpu.memory_space<vmem>>, %arg2: memref<32x128xbf16, #tpu.memory_space<vmem>>, %arg3: memref<64x128xbf16, #tpu.memory_space<vmem>>) attributes {dimension_semantics = [#tpu.dimension_semantics<parallel>], iteration_bounds = array<i64: 1>, scalar_prefetch = 0 : i64, scratch_operands = 0 : i64, tpu.core_type = #tpu.core_type<tc>, window_params = [{transform_indices = @transform_0, window_bounds = array<i64: 64, 32>}, {pipeline_mode = #tpu.pipeline_mode<synchronous>, transform_indices = @transform_1, window_bounds = array<i64: 32, 128>}, {transform_indices = @transform_2, window_bounds = array<i64: 64, 128>}]} {
    %c0 = arith.constant 0 : index
    %c0_0 = arith.constant 0 : index
    %0 = vector.load %arg1[%c0, %c0_0] : memref<64x32xbf16, #tpu.memory_space<vmem>>, vector<64x32xbf16>
    %c0_1 = arith.constant 0 : index
    %c0_2 = arith.constant 0 : index
    %1 = vector.load %arg2[%c0_1, %c0_2] : memref<32x128xbf16, #tpu.memory_space<vmem>>, vector<32x128xbf16>
    %cst = arith.constant dense<0.000000e+00> : vector<64x128xf32>
    %2 = tpu.matmul %0, %1, %cst {dimension_numbers = #tpu.dot_dimension_numbers<[1], [0], [0], [1], [0, 0, 1, 1], [], []>} : vector<64x32xbf16>, vector<32x128xbf16>, vector<64x128xf32> -> vector<64x128xf32>
    %3 = arith.truncf %2 : vector<64x128xf32> to vector<64x128xbf16>
    %c0_3 = arith.constant 0 : index
    %c0_4 = arith.constant 0 : index
    %4 = vector.load %arg3[%c0_3, %c0_4] : memref<64x128xbf16, #tpu.memory_space<vmem>>, vector<64x128xbf16>
    tpu.vector_store %arg3[%c0_3, %c0_4], %3 {strides = array<i32>} : memref<64x128xbf16, #tpu.memory_space<vmem>>, vector<64x128xbf16>,
    return
  }
  func.func @transform_0(%arg0: i32) -> (i32, i32) {
    %c0_i32 = arith.constant 0 : i32
    %c0_i32_0 = arith.constant 0 : i32
    return %arg0, %c0_i32 : i32, i32
  }
  func.func @transform_1(%arg0: i32) -> (i32, i32) {
    %c0_i32 = arith.constant 0 : i32
    %c0_i32_0 = arith.constant 0 : i32
    %c0_i32_1 = arith.constant 0 : i32
    return %c0_i32, %c0_i32_0 : i32, i32
  }
  func.func @transform_2(%arg0: i32) -> (i32, i32) {
    %c0_i32 = arith.constant 0 : i32
    %c0_i32_0 = arith.constant 0 : i32
    return %arg0, %c0_i32 : i32, i32
  }
}

module attributes {stable_mosaic.version = 11 : i64} {
  func.func @_agg_res_kernel(%arg0: i32, %arg1: memref<64x64xbf16, #tpu.memory_space<vmem>>, %arg2: memref<64x128xbf16, #tpu.memory_space<vmem>>, %arg3: memref<1x128xf32, #tpu.memory_space<vmem>>, %arg4: memref<64x128xf32, #tpu.memory_space<vmem>>, %arg5: memref<64x128xf32, #tpu.memory_space<vmem>>) attributes {dimension_semantics = [#tpu.dimension_semantics<parallel>], iteration_bounds = array<i64: 1>, scalar_prefetch = 0 : i64, scratch_operands = 0 : i64, tpu.core_type = #tpu.core_type<tc>, window_params = [{transform_indices = @transform_0, window_bounds = array<i64: 64, 64>}, {pipeline_mode = #tpu.pipeline_mode<synchronous>, transform_indices = @transform_1, window_bounds = array<i64: 64, 128>}, {pipeline_mode = #tpu.pipeline_mode<synchronous>, transform_indices = @transform_2, window_bounds = array<i64: 1, 128>}, {transform_indices = @transform_3, window_bounds = array<i64: 64, 128>}, {transform_indices = @transform_4, window_bounds = array<i64: 64, 128>}]} {
    %c0 = arith.constant 0 : index
    %c0_0 = arith.constant 0 : index
    %0 = vector.load %arg1[%c0, %c0_0] : memref<64x64xbf16, #tpu.memory_space<vmem>>, vector<64x64xbf16>
    %c0_1 = arith.constant 0 : index
    %c0_2 = arith.constant 0 : index
    %1 = vector.load %arg2[%c0_1, %c0_2] : memref<64x128xbf16, #tpu.memory_space<vmem>>, vector<64x128xbf16>
    %cst = arith.constant dense<0.000000e+00> : vector<64x128xf32>
    %2 = tpu.matmul %0, %1, %cst {dimension_numbers = #tpu.dot_dimension_numbers<[1], [0], [0], [1], [0, 0, 1, 1], [], []>} : vector<64x64xbf16>, vector<64x128xbf16>, vector<64x128xf32> -> vector<64x128xf32>
    %c0_3 = arith.constant 0 : index
    %c0_4 = arith.constant 0 : index
    %3 = vector.load %arg3[%c0_3, %c0_4] : memref<1x128xf32, #tpu.memory_space<vmem>>, vector<1x128xf32>
    %4 = vector.broadcast %3 : vector<1x128xf32> to vector<64x128xf32>
    %5 = arith.addf %2, %4 : vector<64x128xf32>
    %cst_5 = arith.constant 0.000000e+00 : f32
    %6 = vector.broadcast %cst_5 : f32 to vector<64x128xf32>
    %7 = arith.maximumf %5, %6 : vector<64x128xf32>
    %c0_6 = arith.constant 0 : index
    %c0_7 = arith.constant 0 : index
    %8 = vector.load %arg4[%c0_6, %c0_7] : memref<64x128xf32, #tpu.memory_space<vmem>>, vector<64x128xf32>
    %9 = arith.addf %7, %8 : vector<64x128xf32>
    %c0_8 = arith.constant 0 : index
    %c0_9 = arith.constant 0 : index
    %10 = vector.load %arg5[%c0_8, %c0_9] : memref<64x128xf32, #tpu.memory_space<vmem>>, vector<64x128xf32>
    tpu.vector_store %arg5[%c0_8, %c0_9], %9 {strides = array<i32>} : memref<64x128xf32, #tpu.memory_space<vmem>>, vector<64x128xf32>,
    return
  }
  func.func @transform_0(%arg0: i32) -> (i32, i32) {
    %c0_i32 = arith.constant 0 : i32
    %c0_i32_0 = arith.constant 0 : i32
    return %arg0, %c0_i32 : i32, i32
  }
  func.func @transform_1(%arg0: i32) -> (i32, i32) {
    %c0_i32 = arith.constant 0 : i32
    %c0_i32_0 = arith.constant 0 : i32
    %c0_i32_1 = arith.constant 0 : i32
    return %c0_i32, %c0_i32_0 : i32, i32
  }
  func.func @transform_2(%arg0: i32) -> (i32, i32) {
    %c0_i32 = arith.constant 0 : i32
    %c0_i32_0 = arith.constant 0 : i32
    %c0_i32_1 = arith.constant 0 : i32
    return %c0_i32, %c0_i32_0 : i32, i32
  }
  func.func @transform_3(%arg0: i32) -> (i32, i32) {
    %c0_i32 = arith.constant 0 : i32
    %c0_i32_0 = arith.constant 0 : i32
    return %arg0, %c0_i32 : i32, i32
  }
  func.func @transform_4(%arg0: i32) -> (i32, i32) {
    %c0_i32 = arith.constant 0 : i32
    %c0_i32_0 = arith.constant 0 : i32
    return %arg0, %c0_i32 : i32, i32
  }
}

module attributes {stable_mosaic.version = 11 : i64} {
  func.func @_proj_bias_kernel(%arg0: i32, %arg1: memref<64x32xbf16, #tpu.memory_space<vmem>>, %arg2: memref<32x128xbf16, #tpu.memory_space<vmem>>, %arg3: memref<1x128xf32, #tpu.memory_space<vmem>>, %arg4: memref<64x128xf32, #tpu.memory_space<vmem>>) attributes {dimension_semantics = [#tpu.dimension_semantics<parallel>], iteration_bounds = array<i64: 1>, scalar_prefetch = 0 : i64, scratch_operands = 0 : i64, tpu.core_type = #tpu.core_type<tc>, window_params = [{transform_indices = @transform_0, window_bounds = array<i64: 64, 32>}, {pipeline_mode = #tpu.pipeline_mode<synchronous>, transform_indices = @transform_1, window_bounds = array<i64: 32, 128>}, {pipeline_mode = #tpu.pipeline_mode<synchronous>, transform_indices = @transform_2, window_bounds = array<i64: 1, 128>}, {transform_indices = @transform_3, window_bounds = array<i64: 64, 128>}]} {
    %c0 = arith.constant 0 : index
    %c0_0 = arith.constant 0 : index
    %0 = vector.load %arg1[%c0, %c0_0] : memref<64x32xbf16, #tpu.memory_space<vmem>>, vector<64x32xbf16>
    %c0_1 = arith.constant 0 : index
    %c0_2 = arith.constant 0 : index
    %1 = vector.load %arg2[%c0_1, %c0_2] : memref<32x128xbf16, #tpu.memory_space<vmem>>, vector<32x128xbf16>
    %cst = arith.constant dense<0.000000e+00> : vector<64x128xf32>
    %2 = tpu.matmul %0, %1, %cst {dimension_numbers = #tpu.dot_dimension_numbers<[1], [0], [0], [1], [0, 0, 1, 1], [], []>} : vector<64x32xbf16>, vector<32x128xbf16>, vector<64x128xf32> -> vector<64x128xf32>
    %c0_3 = arith.constant 0 : index
    %c0_4 = arith.constant 0 : index
    %3 = vector.load %arg3[%c0_3, %c0_4] : memref<1x128xf32, #tpu.memory_space<vmem>>, vector<1x128xf32>
    %4 = vector.broadcast %3 : vector<1x128xf32> to vector<64x128xf32>
    %5 = arith.addf %2, %4 : vector<64x128xf32>
    %c0_5 = arith.constant 0 : index
    %c0_6 = arith.constant 0 : index
    %6 = vector.load %arg4[%c0_5, %c0_6] : memref<64x128xf32, #tpu.memory_space<vmem>>, vector<64x128xf32>
    tpu.vector_store %arg4[%c0_5, %c0_6], %5 {strides = array<i32>} : memref<64x128xf32, #tpu.memory_space<vmem>>, vector<64x128xf32>,
    return
  }
  func.func @transform_0(%arg0: i32) -> (i32, i32) {
    %c0_i32 = arith.constant 0 : i32
    %c0_i32_0 = arith.constant 0 : i32
    return %arg0, %c0_i32 : i32, i32
  }
  func.func @transform_1(%arg0: i32) -> (i32, i32) {
    %c0_i32 = arith.constant 0 : i32
    %c0_i32_0 = arith.constant 0 : i32
    %c0_i32_1 = arith.constant 0 : i32
    return %c0_i32, %c0_i32_0 : i32, i32
  }
  func.func @transform_2(%arg0: i32) -> (i32, i32) {
    %c0_i32 = arith.constant 0 : i32
    %c0_i32_0 = arith.constant 0 : i32
    %c0_i32_1 = arith.constant 0 : i32
    return %c0_i32, %c0_i32_0 : i32, i32
  }
  func.func @transform_3(%arg0: i32) -> (i32, i32) {
    %c0_i32 = arith.constant 0 : i32
    %c0_i32_0 = arith.constant 0 : i32
    return %arg0, %c0_i32 : i32, i32
  }
}

</mosaic_0001>

<bundles_post_ra>
// kernel: _call_res_proj.3
= control target key start
LH: loop header
LB: loop body
LE: loop exit
PB: predicated region body
PF: predicated region fallthrough
CT: control target
= control target key end

     0   :  { %vm56_vm0 = vcmask 261120   ;;  %s226_s1 = inlined_call_operand.vmem [shape: bf16[32,128], index: 1, kind: input, shape index: {}]   ;;  %s227_s0 = inlined_call_operand.vmem [shape: bf16[64,32], index: 0, kind: input, shape index: {}]   ;;  %s228_s2 = inlined_call_operand.vmem [shape: bf16[64,128], index: 2, kind: output, shape index: {}]  }
   0x1   :  { %v151_v0 = vld [vmem:[%s226_s1 + $0x8] sm:$0xff]  ;;  %v150_v1 = vld [vmem:[%s226_s1] sm:$0xff]  ;;  %v148_v4 = vld [vmem:[%s227_s0 + $0x10] sm:$0xff] }
   0x2   :  { %75 = vmatpush.bf16.msra.mxu0 %v151_v0  ;;  %175 = vmatpush.bf16.msra.mxu1 %v151_v0  ;;  %v146_v2 = vld [vmem:[%s227_s0] sm:$0xff]  ;;  %v147_v3 = vld [vmem:[%s227_s0 + $0x8] sm:$0xff]  ;;  %v149_v5 = vld [vmem:[%s227_s0 + $0x18] sm:$0xff] }
   0x3   :  { %176 = vmatpush.bf16.msra.mxu2 %v151_v0  ;;  %177 = vmatpush.bf16.msra.mxu3 %v151_v0 }
   0x6   :  { %76 = vmatpush.bf16.msra.mxu0 %v150_v1  ;;  %178 = vmatpush.bf16.msra.mxu1 %v150_v1 }
   0x7   :  { %179 = vmatpush.bf16.msra.mxu2 %v150_v1  ;;  %180 = vmatpush.bf16.msra.mxu3 %v150_v1 }
   0x9   :  { %142 = vmatmul.msk.bf16.vlgmr.msra.gmra.mxu0 %vm56_vm0, %v146_v2  ;;  %143 = vmatmul.msk.bf16.vlgmr.msra.gmra.mxu1 %vm56_vm0, %v147_v3 }
   0xa   :  { %144 = vmatmul.msk.bf16.vlgmr.msra.gmra.mxu2 %vm56_vm0, %v148_v4  ;;  %145 = vmatmul.msk.bf16.vlgmr.msra.gmra.mxu3 %vm56_vm0, %v149_v5 }
  0x86   :  { %v78_v6 = vpop.f32.mrf.mxu0  ;;  %v83_v7 = vpop.f32.mrf.mxu1 }
  0x8d   :  { %v88_v8 = vpop.f32.mrf.mxu2  ;;  %v93_v9 = vpop.f32.mrf.mxu3 }
  0x8e   :  { %v80_v10 = vpop.f32.mrf.mxu0  ;;  %v85_v11 = vpop.f32.mrf.mxu1 }
  0x8f   :  { %v155_v12 = vpack.c.bf16 %v80_v10, %v78_v6  ;;  %v160_v13 = vpack.c.bf16 %v85_v11, %v83_v7 }
  0x91   :  { %156 = vst [vmem:[%s228_s2] sm:$0xff] %v155_v12  }
  0x92   :  { %172 = vst [vmem:[%s228_s2 + $0x8] sm:$0xff] %v160_v13  }
  0x95   :  { %v90_v14 = vpop.f32.mrf.mxu2  ;;  %v95_v15 = vpop.f32.mrf.mxu3 }
  0x96   :  { %v165_v16 = vpack.c.bf16 %v90_v14, %v88_v8  ;;  %v170_v17 = vpack.c.bf16 %v95_v15, %v93_v9 }
  0x98   :  { %173 = vst [vmem:[%s228_s2 + $0x10] sm:$0xff] %v165_v16  }
  0x99   :  { %174 = vst [vmem:[%s228_s2 + $0x18] sm:$0xff] %v170_v17  }

// kernel: _call_res_proj.4
= control target key start
LH: loop header
LB: loop body
LE: loop exit
PB: predicated region body
PF: predicated region fallthrough
CT: control target
= control target key end

     0   :  { %vm63_vm0 = vcmask 261120   ;;  %s223_s1 = inlined_call_operand.vmem [shape: bf16[32,128], index: 1, kind: input, shape index: {}]   ;;  %s224_s2 = inlined_call_operand.vmem [shape: f32[1,128], index: 2, kind: input, shape index: {}]   ;;  %s225_s0 = inlined_call_operand.vmem [shape: bf16[64,32], index: 0, kind: input, shape index: {}]   ;;  %s226_s3 = inlined_call_operand.vmem [shape: f32[64,128], index: 3, kind: output, shape index: {}]  }
   0x1   :  { %v150_v0 = vld [vmem:[%s223_s1 + $0x8] sm:$0xff]  ;;  %v149_v1 = vld [vmem:[%s223_s1] sm:$0xff]  ;;  %v147_v4 = vld [vmem:[%s225_s0 + $0x10] sm:$0xff] }
   0x2   :  { %82 = vmatpush.bf16.msra.mxu0 %v150_v0  ;;  %151 = vmatpush.bf16.msra.mxu1 %v150_v0  ;;  %v145_v2 = vld [vmem:[%s225_s0] sm:$0xff]  ;;  %v146_v3 = vld [vmem:[%s225_s0 + $0x8] sm:$0xff]  ;;  %v148_v5 = vld [vmem:[%s225_s0 + $0x18] sm:$0xff] }
   0x3   :  { %152 = vmatpush.bf16.msra.mxu2 %v150_v0  ;;  %153 = vmatpush.bf16.msra.mxu3 %v150_v0  ;;  %v157_v6 = vld [vmem:[%s224_s2] ss:$0 sm:$0xff] }
   0x6   :  { %83 = vmatpush.bf16.msra.mxu0 %v149_v1  ;;  %154 = vmatpush.bf16.msra.mxu1 %v149_v1 }
   0x7   :  { %155 = vmatpush.bf16.msra.mxu2 %v149_v1  ;;  %156 = vmatpush.bf16.msra.mxu3 %v149_v1 }
   0x9   :  { %141 = vmatmul.msk.bf16.vlgmr.msra.gmra.mxu0 %vm63_vm0, %v145_v2  ;;  %142 = vmatmul.msk.bf16.vlgmr.msra.gmra.mxu1 %vm63_vm0, %v146_v3 }
   0xa   :  { %143 = vmatmul.msk.bf16.vlgmr.msra.gmra.mxu2 %vm63_vm0, %v147_v4  ;;  %144 = vmatmul.msk.bf16.vlgmr.msra.gmra.mxu3 %vm63_vm0, %v148_v5 }
  0x86   :  { %v85_v7 = vpop.f32.mrf.mxu0  ;;  %v90_v8 = vpop.f32.mrf.mxu1 }
  0x87   :  { %v86_v9 = vadd.f32 %v157_v6, %v85_v7  ;;  %v91_v10 = vadd.f32 %v157_v6, %v90_v8 }
  0x89   :  { %105 = vst [vmem:[%s226_s3] sm:$0xff] %v86_v9 }
  0x8a   :  { %107 = vst [vmem:[%s226_s3 + $0x10] sm:$0xff] %v91_v10 }
  0x8d   :  { %v95_v11 = vpop.f32.mrf.mxu2  ;;  %v100_v12 = vpop.f32.mrf.mxu3 }
  0x8e   :  { %v96_v13 = vadd.f32 %v157_v6, %v95_v11  ;;  %v101_v14 = vadd.f32 %v157_v6, %v100_v12  ;;  %v87_v15 = vpop.f32.mrf.mxu0  ;;  %v92_v16 = vpop.f32.mrf.mxu1 }
  0x8f   :  { %v88_v17 = vadd.f32 %v157_v6, %v87_v15  ;;  %v93_v18 = vadd.f32 %v157_v6, %v92_v16 }
  0x90   :  { %109 = vst [vmem:[%s226_s3 + $0x20] sm:$0xff] %v96_v13 }
  0x91   :  { %111 = vst [vmem:[%s226_s3 + $0x30] sm:$0xff] %v101_v14 }
  0x92   :  { %106 = vst [vmem:[%s226_s3 + $0x8] sm:$0xff] %v88_v17 }
  0x93   :  { %108 = vst [vmem:[%s226_s3 + $0x18] sm:$0xff] %v93_v18 }
  0x95   :  { %v97_v19 = vpop.f32.mrf.mxu2  ;;  %v102_v20 = vpop.f32.mrf.mxu3 }
  0x96   :  { %v98_v21 = vadd.f32 %v157_v6, %v97_v19  ;;  %v103_v22 = vadd.f32 %v157_v6, %v102_v20 }
  0x98   :  { %110 = vst [vmem:[%s226_s3 + $0x28] sm:$0xff] %v98_v21 }
  0x99   :  { %112 = vst [vmem:[%s226_s3 + $0x38] sm:$0xff] %v103_v22 }

// kernel: _call_res_proj.5
= control target key start
LH: loop header
LB: loop body
LE: loop exit
PB: predicated region body
PF: predicated region fallthrough
CT: control target
= control target key end

     0   :  { %s343_s0 = inlined_call_operand.vmem [shape: bf16[64,64], index: 0, kind: input, shape index: {}]   ;;  %s344_s1 = inlined_call_operand.vmem [shape: bf16[64,128], index: 1, kind: input, shape index: {}]   ;;  %s345_s2 = inlined_call_operand.vmem [shape: f32[1,128], index: 2, kind: input, shape index: {}]   ;;  %s346_s3 = inlined_call_operand.vmem [shape: f32[64,128], index: 3, kind: input, shape index: {}]   ;;  %s347_s4 = inlined_call_operand.hbm [shape: f32[64,128], index: 4, kind: output, shape index: {}]  }
   0x1   :  { %v218_v0 = vld [vmem:[%s344_s1 + $0x18] sm:$0xff]  ;;  %v217_v1 = vld [vmem:[%s344_s1 + $0x10] sm:$0xff] }
   0x2   :  { %100 = vmatpush.bf16.msra.mxu0 %v218_v0  ;;  %219 = vmatpush.bf16.msra.mxu1 %v218_v0 }
   0x3   :  { %220 = vmatpush.bf16.msra.mxu2 %v218_v0  ;;  %221 = vmatpush.bf16.msra.mxu3 %v218_v0 }
   0x4   :  { %9 = vsyncpa [#allocation3], 0  ;;  %v216_v2 = vld [vmem:[%s344_s1 + $0x8] sm:$0xff]  ;;  %v215_v3 = vld [vmem:[%s344_s1] sm:$0xff]  ;;  %vm83_vm0 = vcmask 523264   ;;  %s261_s20 = smov [#allocation2]  }
   0x5   :  { %v211_v4 = vld [vmem:[%s343_s0] sm:$0xff]  ;;  %v212_v5 = vld [vmem:[%s343_s0 + $0x8] sm:$0xff]  ;;  %v213_v6 = vld [vmem:[%s343_s0 + $0x10] sm:$0xff]  ;;  %s161_s21 = sshll.u32 %s261_s20, 4  ;;  %s163_s24 = sshll.u32 %s347_s4, 4  ;;  %s162_s21 = int_to_ptr.vmem [resolvable:$true] %s161_s21  ;;  %s164_s24 = int_to_ptr.hbm [resolvable:$true] %s163_s24 }
   0x6   :  { %101 = vmatpush.bf16.msra.mxu0 %v217_v1  ;;  %222 = vmatpush.bf16.msra.mxu1 %v217_v1  ;;  %v214_v7 = vld [vmem:[%s343_s0 + $0x18] sm:$0xff]  ;;  %v234_v8 = vld [vmem:[%s345_s2] ss:$0 sm:$0xff]  ;;  %v135_v14 = vld [vmem:[%s346_s3 + $0x10] sm:$0xff]  ;;  %s262_s25 = smov 128   ;;  %s263_s26 = smov 8  }
   0x7   :  { %223 = vmatpush.bf16.msra.mxu2 %v217_v1  ;;  %224 = vmatpush.bf16.msra.mxu3 %v217_v1  ;;  %v133_v13 = vld [vmem:[%s346_s3] sm:$0xff]  ;;  %v139_v26 = vld [vmem:[%s346_s3 + $0x30] sm:$0xff]  ;;  %v134_v31 = vld [vmem:[%s346_s3 + $0x8] sm:$0xff] }
   0x8   :  { %v137_v25 = vld [vmem:[%s346_s3 + $0x20] sm:$0xff]  ;;  %v136_v32 = vld [vmem:[%s346_s3 + $0x18] sm:$0xff]  ;;  %v138_v43 = vld [vmem:[%s346_s3 + $0x28] sm:$0xff] }
   0x9   :  { %v140_v44 = vld [vmem:[%s346_s3 + $0x38] sm:$0xff] }
   0xa   :  { %102 = vmatpush.bf16.msra.mxu0 %v216_v2  ;;  %225 = vmatpush.bf16.msra.mxu1 %v216_v2 }
   0xb   :  { %226 = vmatpush.bf16.msra.mxu2 %v216_v2  ;;  %227 = vmatpush.bf16.msra.mxu3 %v216_v2 }
   0xe   :  { %103 = vmatpush.bf16.msra.mxu0 %v215_v3  ;;  %228 = vmatpush.bf16.msra.mxu1 %v215_v3 }
   0xf   :  { %229 = vmatpush.bf16.msra.mxu2 %v215_v3  ;;  %230 = vmatpush.bf16.msra.mxu3 %v215_v3 }
  0x11   :  { %207 = vmatmul.msk.bf16.vlgmr.msra.gmra.mxu0 %vm83_vm0, %v211_v4  ;;  %208 = vmatmul.msk.bf16.vlgmr.msra.gmra.mxu1 %vm83_vm0, %v212_v5 }
  0x12   :  { %209 = vmatmul.msk.bf16.vlgmr.msra.gmra.mxu2 %vm83_vm0, %v213_v6  ;;  %210 = vmatmul.msk.bf16.vlgmr.msra.gmra.mxu3 %vm83_vm0, %v214_v7 }
  0x8e   :  { %v105_v9 = vpop.f32.mrf.mxu0  ;;  %v110_v10 = vpop.f32.mrf.mxu1 }
  0x8f   :  { %v106_v11 = vadd.f32 %v234_v8, %v105_v9  ;;  %v111_v12 = vadd.f32 %v234_v8, %v110_v10 }
  0x91   :  { %v125_v15 = vmax.f32 %v106_v11, 0.0  ;;  %v127_v16 = vmax.f32 %v111_v12, 0.0 }
  0x93   :  { %v141_v17 = vadd.f32 %v133_v13, %v125_v15  ;;  %v143_v18 = vadd.f32 %v135_v14, %v127_v16 }
  0x95   :  { %149 = vst [vmem:[#allocation2] sm:$0xff] %v141_v17  ;;  %v115_v19 = vpop.f32.mrf.mxu2  ;;  %v120_v20 = vpop.f32.mrf.mxu3 }
  0x96   :  { %151 = vst [vmem:[#allocation2 + $0x10] sm:$0xff] %v143_v18  ;;  %v116_v21 = vadd.f32 %v234_v8, %v115_v19  ;;  %v121_v22 = vadd.f32 %v234_v8, %v120_v20  ;;  %v107_v23 = vpop.f32.mrf.mxu0  ;;  %v112_v24 = vpop.f32.mrf.mxu1 }
  0x97   :  { %v108_v27 = vadd.f32 %v234_v8, %v107_v23  ;;  %v113_v28 = vadd.f32 %v234_v8, %v112_v24 }
  0x98   :  { %v129_v29 = vmax.f32 %v116_v21, 0.0  ;;  %v131_v30 = vmax.f32 %v121_v22, 0.0 }
  0x99   :  { %v126_v33 = vmax.f32 %v108_v27, 0.0  ;;  %v128_v34 = vmax.f32 %v113_v28, 0.0 }
  0x9a   :  { %v145_v35 = vadd.f32 %v137_v25, %v129_v29  ;;  %v147_v36 = vadd.f32 %v139_v26, %v131_v30 }
  0x9b   :  { %v142_v37 = vadd.f32 %v134_v31, %v126_v33  ;;  %v144_v38 = vadd.f32 %v136_v32, %v128_v34 }
  0x9c   :  { %153 = vst [vmem:[#allocation2 + $0x20] sm:$0xff] %v145_v35 }
  0x9d   :  { %155 = vst [vmem:[#allocation2 + $0x30] sm:$0xff] %v147_v36  ;;  %v117_v39 = vpop.f32.mrf.mxu2  ;;  %v122_v40 = vpop.f32.mrf.mxu3 }
  0x9e   :  { %150 = vst [vmem:[#allocation2 + $0x8] sm:$0xff] %v142_v37  ;;  %v118_v41 = vadd.f32 %v234_v8, %v117_v39  ;;  %v123_v42 = vadd.f32 %v234_v8, %v122_v40 }
  0x9f   :  { %152 = vst [vmem:[#allocation2 + $0x18] sm:$0xff] %v144_v38 }
  0xa0   :  { %v130_v45 = vmax.f32 %v118_v41, 0.0  ;;  %v132_v46 = vmax.f32 %v123_v42, 0.0 }
  0xa2   :  { %v146_v47 = vadd.f32 %v138_v43, %v130_v45  ;;  %v148_v48 = vadd.f32 %v140_v44, %v132_v46 }
  0xa4   :  { %154 = vst [vmem:[#allocation2 + $0x28] sm:$0xff] %v146_v47 }
  0xa5   :  { %156 = vst [vmem:[#allocation2 + $0x38] sm:$0xff] %v148_v48 }
  0xa6   :  { %169 = dma.vmem_to_hbm [thread:$0]  %s162_s21, 1024, %s164_s24, [#allocation3], %s262_s25, %s262_s25, %s263_s26  }
  0xa7   :  { %259 = dma.done.wait [#allocation3], 1024  }
  0xa8   :  { %260 = vsyncadd [#allocation3], 4294966272 }
  0xa9   :  { %174 = vsyncpa [#allocation3], 1 }

</bundles_post_ra>
